<compile_context>
chip_gen: v6e
topology: v6e:2x2x1
jax: 0.10.0
libtpu: 0.0.40
codegen_flags: <defaults>
</compile_context>

<pallas_src>
import functools

import numpy as np
import jax
import jax.numpy as jnp
from jax import lax
from jax.experimental import pallas as pl
from jax.experimental.pallas import tpu as pltpu

# ---------------- problem configuration (small, synthetic) ----------------
N, CIN, COUT = 2, 4, 8
H = W = 16
DIL = 2                       # dilation of conv1 (padding = DIL -> spatial size preserved)
EPS = 1e-5
CPAD = ((CIN + 7) // 8) * 8   # input channels padded to a sublane tile (8)

# packed-parameter slab layout: 128-lane-aligned segments inside one (COUT, 512) array
OFF_W1, OFF_W2, OFF_WM, OFF_T = 0, 128, 256, 384
SLAB_W = 512


# ---------------- Pallas kernel ----------------
def resblock_kernel(x_ref, p_ref, mask_ref, out_ref, buf1_ref, buf2_ref,
                    *, hh, ww, dil, cpad, cout):
    # x_ref   : (cpad, m)   channels-major, spatially flattened whole image(s);
    #                       channels >= CIN are zero.
    # p_ref   : (cout, 512) packed params: [0:72]=conv1 w (BN1 scale folded, im2col K),
    #                       [128:200]=conv2 w (BN2 folded), [256:264]=1x1 skip w,
    #                       [384]=bn1 shift, [385]=bn2 shift, [386]=skip bias.
    # mask_ref: (16, m)     f32 tap-validity masks; rows 0-7 = conv1 non-center taps,
    #                       rows 8-15 = conv2 non-center taps (precomputed, static).
    # out_ref : (cout, m)
    # buf1_ref: (9*cpad, m) im2col scratch for conv1
    # buf2_ref: (9*cout, m) im2col scratch for conv2
    m = x_ref.shape[1]
    x = x_ref[...]                                            # (cpad, m)

    def im2col(a, d, buf, mask_base):
        # a: (rows, m); writes 9 shifted taps into buf (9*rows, m), tap-major order
        # matching the wrapper's weight reshape.  Wraparound of the lane roll only
        # touches lanes the spatial mask zeroes (blocks are whole images).
        rows = a.shape[0]
        mi = 0
        for ky in range(3):
            for kx in range(3):
                idx = ky * 3 + kx
                dy = (ky - 1) * d
                dx = (kx - 1) * d
                t = dy * ww + dx
                if t == 0:
                    buf[pl.ds(idx * rows, rows), :] = a
                else:
                    shifted = pltpu.roll(a, shift=(-t) % m, axis=1)
                    msk = mask_ref[pl.ds(mask_base + mi, 1), :]          # (1, m)
                    buf[pl.ds(idx * rows, rows), :] = shifted * msk
                    mi += 1

    w1 = p_ref[:, pl.ds(OFF_W1, 9 * cpad)]     # (cout, 9*cpad)
    w2 = p_ref[:, pl.ds(OFF_W2, 9 * cout)]     # (cout, 9*cout)
    wm = p_ref[:, pl.ds(OFF_WM, cpad)]         # (cout, cpad)
    sh = p_ref[:, pl.ds(OFF_T, 3)]             # (cout, 3) = [t1 | t2 | bm]

    # ---- conv1 (3x3, dilation=dil; BN1 scale folded) + shift + ReLU ----
    im2col(x, dil, buf1_ref, 0)
    act1 = jnp.maximum(
        jnp.dot(w1, buf1_ref[...], preferred_element_type=jnp.float32) + sh[:, 0:1],
        0.0)                                                  # (cout, m)

    # ---- conv2 (3x3, dilation=1; BN2 scale folded) + shift ----
    im2col(act1, 1, buf2_ref, 8)
    out2 = jnp.dot(w2, buf2_ref[...], preferred_element_type=jnp.float32) + sh[:, 1:2]

    # ---- identity branch: 1x1 match_channels conv ----
    ident = jnp.dot(wm, x, preferred_element_type=jnp.float32) + sh[:, 2:3]

    # ---- residual add + ReLU (fully lane-dense store) ----
    out_ref[...] = jnp.maximum(out2 + ident, 0.0)


# ---------------- static tap-mask construction (numpy -> trace-time constant) ----------------
def build_tap_masks(n_imgs, h, w, dil1, dil2):
    m = n_imgs * h * w
    lane = np.arange(m)
    xi = lane % w
    yi = (lane // w) % h
    rows = []
    for d in (dil1, dil2):
        for ky in range(3):
            for kx in range(3):
                if ky == 1 and kx == 1:
                    continue                    # center tap is always valid
                dy = (ky - 1) * d
                dx = (kx - 1) * d
                valid = ((xi + dx >= 0) & (xi + dx < w) &
                         (yi + dy >= 0) & (yi + dy < h))
                rows.append(valid.astype(np.float32))
    return np.stack(rows, axis=0)               # (16, m)


# ---------------- wrapper (jitted so layout plumbing fuses with the call) ----------------
@functools.partial(jax.jit, static_argnames=("dil", "split_batch"))
def residual_block_pallas(x_nchw, slab, *, dil=DIL, split_batch=False):
    n, cin, h, w = x_nchw.shape
    cout = slab.shape[0]
    cpad = CPAD
    m = n * h * w

    # channels-major, spatially flattened, channel-padded input
    x_cm = jnp.transpose(x_nchw, (1, 0, 2, 3)).reshape(cin, m)
    x_flat = jnp.pad(x_cm, ((0, cpad - cin), (0, 0)))

    if split_batch:                       # v7x: one whole image per grid step, 2 TCs
        nblk, m_blk = n, h * w
        semantics = ("parallel",)
    else:                                 # v5e/v6e: whole problem in one invocation
        nblk, m_blk = 1, m
        semantics = ("arbitrary",)

    mask = jnp.asarray(build_tap_masks(m_blk // (h * w), h, w, dil, 1))

    kernel = functools.partial(resblock_kernel, hh=h, ww=w, dil=dil,
                               cpad=cpad, cout=cout)

    out_cm = pl.pallas_call(
        kernel,
        out_shape=jax.ShapeDtypeStruct((cout, m), jnp.float32),
        grid_spec=pltpu.PrefetchScalarGridSpec(
            num_scalar_prefetch=0,
            grid=(nblk,),
            in_specs=[
                pl.BlockSpec((cpad, m_blk), lambda i: (0, i)),     # activations
                pl.BlockSpec((cout, SLAB_W), lambda i: (0, 0)),    # packed params
                pl.BlockSpec((16, m_blk), lambda i: (0, 0)),       # tap masks
            ],
            out_specs=pl.BlockSpec((cout, m_blk), lambda i: (0, i)),
            scratch_shapes=[
                pltpu.VMEM((9 * cpad, m_blk), jnp.float32),        # conv1 im2col
                pltpu.VMEM((9 * cout, m_blk), jnp.float32),        # conv2 im2col
            ],
        ),
        compiler_params=pltpu.CompilerParams(dimension_semantics=semantics),
    )(x_flat, slab, mask)

    # back to PyTorch-style NCHW
    return out_cm.reshape(cout, n, h, w).transpose(1, 0, 2, 3)


# ---------------- deterministic parameter construction ----------------
def make_params(key):
    ks = jax.random.split(key, 6)
    w1 = 0.1 * jax.random.normal(ks[0], (3, 3, CIN, COUT), jnp.float32)   # HWIO
    b1 = 0.05 * jax.random.normal(ks[1], (COUT,), jnp.float32)
    w2 = 0.1 * jax.random.normal(ks[2], (3, 3, COUT, COUT), jnp.float32)  # HWIO
    b2 = 0.05 * jax.random.normal(ks[3], (COUT,), jnp.float32)
    wm = 0.1 * jax.random.normal(ks[4], (CIN, COUT), jnp.float32)
    bm = 0.05 * jax.random.normal(ks[5], (COUT,), jnp.float32)

    # BatchNorm (eval mode) parameters
    g1 = 1.0 + 0.1 * jnp.arange(COUT, dtype=jnp.float32)
    be1 = 0.01 * jnp.arange(COUT, dtype=jnp.float32)
    m1 = 0.02 * jnp.arange(COUT, dtype=jnp.float32)
    v1 = 1.0 + 0.05 * jnp.arange(COUT, dtype=jnp.float32)

    g2 = 1.0 - 0.05 * jnp.arange(COUT, dtype=jnp.float32) / COUT
    be2 = -0.01 * jnp.arange(COUT, dtype=jnp.float32)
    m2 = -0.02 * jnp.arange(COUT, dtype=jnp.float32)
    v2 = 1.0 + 0.03 * jnp.arange(COUT, dtype=jnp.float32)

    # fold conv bias + BN (eval) into per-channel scale & shift:
    #   y = conv_nobias * s + t,  s = gamma/sqrt(var+eps),  t = (bias-mean)*s + beta
    s1 = g1 / jnp.sqrt(v1 + EPS)
    t1 = (b1 - m1) * s1 + be1
    s2 = g2 / jnp.sqrt(v2 + EPS)
    t2 = (b2 - m2) * s2 + be2

    # fold BN scale into conv weights; pad in-channels; transpose to (COUT, K) im2col
    w1s = w1 * s1
    w1p = jnp.zeros((3, 3, CPAD, COUT), jnp.float32).at[:, :, :CIN, :].set(w1s)
    w1k = w1p.reshape(9 * CPAD, COUT).T                        # (COUT, 72) tap-major K
    w2k = (w2 * s2).reshape(9 * COUT, COUT).T                  # (COUT, 72)
    wmk = jnp.zeros((COUT, CPAD), jnp.float32).at[:, :CIN].set(wm.T)

    # pack everything into one lane-aligned slab
    slab = jnp.zeros((COUT, SLAB_W), jnp.float32)
    slab = slab.at[:, OFF_W1:OFF_W1 + 9 * CPAD].set(w1k)
    slab = slab.at[:, OFF_W2:OFF_W2 + 9 * COUT].set(w2k)
    slab = slab.at[:, OFF_WM:OFF_WM + CPAD].set(wmk)
    slab = slab.at[:, OFF_T + 0].set(t1)
    slab = slab.at[:, OFF_T + 1].set(t2)
    slab = slab.at[:, OFF_T + 2].set(bm)

    raw = dict(w1=w1, b1=b1, w2=w2, b2=b2, wm=wm, bm=bm,
               g1=g1, be1=be1, m1=m1, v1=v1, g2=g2, be2=be2, m2=m2, v2=v2)
    return slab, raw


# ---------------- pure-JAX reference (mirrors the PyTorch forward, eval-mode BN) ----------------
def ref_forward(x_nchw, raw, *, dil=DIL):
    x = jnp.transpose(x_nchw, (0, 2, 3, 1))                    # NHWC
    dn = ("NHWC", "HWIO", "NHWC")
    y1 = lax.conv_general_dilated(
        x, raw["w1"], (1, 1), ((dil, dil), (dil, dil)),
        rhs_dilation=(dil, dil), dimension_numbers=dn) + raw["b1"]
    y1 = (y1 - raw["m1"]) / jnp.sqrt(raw["v1"] + EPS) * raw["g1"] + raw["be1"]
    y1 = jnp.maximum(y1, 0.0)

    y2 = lax.conv_general_dilated(
        y1, raw["w2"], (1, 1), ((1, 1), (1, 1)), dimension_numbers=dn) + raw["b2"]
    y2 = (y2 - raw["m2"]) / jnp.sqrt(raw["v2"] + EPS) * raw["g2"] + raw["be2"]

    ident = lax.conv_general_dilated(
        x, raw["wm"].reshape(1, 1, CIN, COUT), (1, 1), ((0, 0), (0, 0)),
        dimension_numbers=dn) + raw["bm"]
    out = jnp.maximum(y2 + ident, 0.0)
    return jnp.transpose(out, (0, 3, 1, 2))                    # back to NCHW


def _on_v7x():
    try:
        return "v7" in jax.devices()[0].device_kind.lower()
    except Exception:
        return False


if __name__ == "__main__":
    key = jax.random.PRNGKey(0)
    kx, kp = jax.random.split(key)

    # PyTorch-style NCHW input
    x_nchw = jax.random.normal(kx, (N, CIN, H, W), jnp.float32)
    slab, raw = make_params(kp)

    # v7x: split the batch over both TensorCores; v5e/v6e: single fused invocation.
    split_batch = _on_v7x()

    out = residual_block_pallas(x_nchw, slab, dil=DIL, split_batch=split_batch)
    out = jax.block_until_ready(out)

    ref = jax.block_until_ready(ref_forward(x_nchw, raw))
    assert out.shape == (N, COUT, H, W)
    assert jnp.allclose(out, ref, atol=1e-4, rtol=1e-4), \
        f"max abs err {jnp.max(jnp.abs(out - ref))}"

    print("KERNEL_OK")
</pallas_src>

<mosaic_0001>
module attributes {stable_mosaic.version = 11 : i64} {
  func.func @resblock_kernel(%arg0: i32, %arg1: memref<8x512xf32, #tpu.memory_space<vmem>>, %arg2: memref<8x512xf32, #tpu.memory_space<vmem>>, %arg3: memref<16x512xf32, #tpu.memory_space<vmem>>, %arg4: memref<8x512xf32, #tpu.memory_space<vmem>>, %arg5: memref<72x512xf32, #tpu.memory_space<vmem>>, %arg6: memref<72x512xf32, #tpu.memory_space<vmem>>) attributes {dimension_semantics = [#tpu.dimension_semantics<arbitrary>], iteration_bounds = array<i64: 1>, scalar_prefetch = 0 : i64, scratch_operands = 2 : i64, tpu.core_type = #tpu.core_type<tc>, window_params = [{transform_indices = @transform_0, window_bounds = array<i64: 8, 512>}, {pipeline_mode = #tpu.pipeline_mode<synchronous>, transform_indices = @transform_1, window_bounds = array<i64: 8, 512>}, {pipeline_mode = #tpu.pipeline_mode<synchronous>, transform_indices = @transform_2, window_bounds = array<i64: 16, 512>}, {transform_indices = @transform_3, window_bounds = array<i64: 8, 512>}]} {
    %c0 = arith.constant 0 : index
    %c0_0 = arith.constant 0 : index
    %0 = vector.load %arg1[%c0, %c0_0] : memref<8x512xf32, #tpu.memory_space<vmem>>, vector<8x512xf32>
    %c0_1 = arith.constant 0 : index
    %c0_2 = arith.constant 0 : index
    %1 = vector.load %arg2[%c0_1, %c0_2] : memref<8x512xf32, #tpu.memory_space<vmem>>, vector<8x72xf32>
    %c0_3 = arith.constant 0 : index
    %c128 = arith.constant 128 : index
    %2 = vector.load %arg2[%c0_3, %c128] : memref<8x512xf32, #tpu.memory_space<vmem>>, vector<8x72xf32>
    %c0_4 = arith.constant 0 : index
    %c256 = arith.constant 256 : index
    %3 = vector.load %arg2[%c0_4, %c256] : memref<8x512xf32, #tpu.memory_space<vmem>>, vector<8x8xf32>
    %c0_5 = arith.constant 0 : index
    %c384 = arith.constant 384 : index
    %4 = vector.load %arg2[%c0_5, %c384] : memref<8x512xf32, #tpu.memory_space<vmem>>, vector<8x3xf32>
    %c34_i32 = arith.constant 34 : i32
    %5 = tpu.dynamic_rotate %0 by %c34_i32 dim 1 : vector<8x512xf32>, i32 -> vector<8x512xf32>
    %c0_6 = arith.constant 0 : index
    %c0_7 = arith.constant 0 : index
    %6 = vector.load %arg3[%c0_6, %c0_7] : memref<16x512xf32, #tpu.memory_space<vmem>>, vector<1x512xf32>
    %7 = vector.broadcast %6 : vector<1x512xf32> to vector<8x512xf32>
    %8 = arith.mulf %5, %7 : vector<8x512xf32>
    %c0_8 = arith.constant 0 : index
    %c0_9 = arith.constant 0 : index
    %9 = vector.load %arg5[%c0_8, %c0_9] : memref<72x512xf32, #tpu.memory_space<vmem>>, vector<8x512xf32>
    tpu.vector_store %arg5[%c0_8, %c0_9], %8 {strides = array<i32>} : memref<72x512xf32, #tpu.memory_space<vmem>>, vector<8x512xf32>,
    %c32_i32 = arith.constant 32 : i32
    %10 = tpu.dynamic_rotate %0 by %c32_i32 dim 1 : vector<8x512xf32>, i32 -> vector<8x512xf32>
    %c1 = arith.constant 1 : index
    %c0_10 = arith.constant 0 : index
    %11 = vector.load %arg3[%c1, %c0_10] : memref<16x512xf32, #tpu.memory_space<vmem>>, vector<1x512xf32>
    %12 = vector.broadcast %11 : vector<1x512xf32> to vector<8x512xf32>
    %13 = arith.mulf %10, %12 : vector<8x512xf32>
    %c8 = arith.constant 8 : index
    %c0_11 = arith.constant 0 : index
    %14 = vector.load %arg5[%c8, %c0_11] : memref<72x512xf32, #tpu.memory_space<vmem>>, vector<8x512xf32>
    tpu.vector_store %arg5[%c8, %c0_11], %13 {strides = array<i32>} : memref<72x512xf32, #tpu.memory_space<vmem>>, vector<8x512xf32>,
    %c30_i32 = arith.constant 30 : i32
    %15 = tpu.dynamic_rotate %0 by %c30_i32 dim 1 : vector<8x512xf32>, i32 -> vector<8x512xf32>
    %c2 = arith.constant 2 : index
    %c0_12 = arith.constant 0 : index
    %16 = vector.load %arg3[%c2, %c0_12] : memref<16x512xf32, #tpu.memory_space<vmem>>, vector<1x512xf32>
    %17 = vector.broadcast %16 : vector<1x512xf32> to vector<8x512xf32>
    %18 = arith.mulf %15, %17 : vector<8x512xf32>
    %c16 = arith.constant 16 : index
    %c0_13 = arith.constant 0 : index
    %19 = vector.load %arg5[%c16, %c0_13] : memref<72x512xf32, #tpu.memory_space<vmem>>, vector<8x512xf32>
    tpu.vector_store %arg5[%c16, %c0_13], %18 {strides = array<i32>} : memref<72x512xf32, #tpu.memory_space<vmem>>, vector<8x512xf32>,
    %c2_i32 = arith.constant 2 : i32
    %20 = tpu.dynamic_rotate %0 by %c2_i32 dim 1 : vector<8x512xf32>, i32 -> vector<8x512xf32>
    %c3 = arith.constant 3 : index
    %c0_14 = arith.constant 0 : index
    %21 = vector.load %arg3[%c3, %c0_14] : memref<16x512xf32, #tpu.memory_space<vmem>>, vector<1x512xf32>
    %22 = vector.broadcast %21 : vector<1x512xf32> to vector<8x512xf32>
    %23 = arith.mulf %20, %22 : vector<8x512xf32>
    %c24 = arith.constant 24 : index
    %c0_15 = arith.constant 0 : index
    %24 = vector.load %arg5[%c24, %c0_15] : memref<72x512xf32, #tpu.memory_space<vmem>>, vector<8x512xf32>
    tpu.vector_store %arg5[%c24, %c0_15], %23 {strides = array<i32>} : memref<72x512xf32, #tpu.memory_space<vmem>>, vector<8x512xf32>,
    %c32 = arith.constant 32 : index
    %c0_16 = arith.constant 0 : index
    %25 = vector.load %arg5[%c32, %c0_16] : memref<72x512xf32, #tpu.memory_space<vmem>>, vector<8x512xf32>
    tpu.vector_store %arg5[%c32, %c0_16], %0 {strides = array<i32>} : memref<72x512xf32, #tpu.memory_space<vmem>>, vector<8x512xf32>,
    %c510_i32 = arith.constant 510 : i32
    %26 = tpu.dynamic_rotate %0 by %c510_i32 dim 1 : vector<8x512xf32>, i32 -> vector<8x512xf32>
    %c4 = arith.constant 4 : index
    %c0_17 = arith.constant 0 : index
    %27 = vector.load %arg3[%c4, %c0_17] : memref<16x512xf32, #tpu.memory_space<vmem>>, vector<1x512xf32>
    %28 = vector.broadcast %27 : vector<1x512xf32> to vector<8x512xf32>
    %29 = arith.mulf %26, %28 : vector<8x512xf32>
    %c40 = arith.constant 40 : index
    %c0_18 = arith.constant 0 : index
    %30 = vector.load %arg5[%c40, %c0_18] : memref<72x512xf32, #tpu.memory_space<vmem>>, vector<8x512xf32>
    tpu.vector_store %arg5[%c40, %c0_18], %29 {strides = array<i32>} : memref<72x512xf32, #tpu.memory_space<vmem>>, vector<8x512xf32>,
    %c482_i32 = arith.constant 482 : i32
    %31 = tpu.dynamic_rotate %0 by %c482_i32 dim 1 : vector<8x512xf32>, i32 -> vector<8x512xf32>
    %c5 = arith.constant 5 : index
    %c0_19 = arith.constant 0 : index
    %32 = vector.load %arg3[%c5, %c0_19] : memref<16x512xf32, #tpu.memory_space<vmem>>, vector<1x512xf32>
    %33 = vector.broadcast %32 : vector<1x512xf32> to vector<8x512xf32>
    %34 = arith.mulf %31, %33 : vector<8x512xf32>
    %c48 = arith.constant 48 : index
    %c0_20 = arith.constant 0 : index
    %35 = vector.load %arg5[%c48, %c0_20] : memref<72x512xf32, #tpu.memory_space<vmem>>, vector<8x512xf32>
    tpu.vector_store %arg5[%c48, %c0_20], %34 {strides = array<i32>} : memref<72x512xf32, #tpu.memory_space<vmem>>, vector<8x512xf32>,
    %c480_i32 = arith.constant 480 : i32
    %36 = tpu.dynamic_rotate %0 by %c480_i32 dim 1 : vector<8x512xf32>, i32 -> vector<8x512xf32>
    %c6 = arith.constant 6 : index
    %c0_21 = arith.constant 0 : index
    %37 = vector.load %arg3[%c6, %c0_21] : memref<16x512xf32, #tpu.memory_space<vmem>>, vector<1x512xf32>
    %38 = vector.broadcast %37 : vector<1x512xf32> to vector<8x512xf32>
    %39 = arith.mulf %36, %38 : vector<8x512xf32>
    %c56 = arith.constant 56 : index
    %c0_22 = arith.constant 0 : index
    %40 = vector.load %arg5[%c56, %c0_22] : memref<72x512xf32, #tpu.memory_space<vmem>>, vector<8x512xf32>
    tpu.vector_store %arg5[%c56, %c0_22], %39 {strides = array<i32>} : memref<72x512xf32, #tpu.memory_space<vmem>>, vector<8x512xf32>,
    %c478_i32 = arith.constant 478 : i32
    %41 = tpu.dynamic_rotate %0 by %c478_i32 dim 1 : vector<8x512xf32>, i32 -> vector<8x512xf32>
    %c7 = arith.constant 7 : index
    %c0_23 = arith.constant 0 : index
    %42 = vector.load %arg3[%c7, %c0_23] : memref<16x512xf32, #tpu.memory_space<vmem>>, vector<1x512xf32>
    %43 = vector.broadcast %42 : vector<1x512xf32> to vector<8x512xf32>
    %44 = arith.mulf %41, %43 : vector<8x512xf32>
    %c64 = arith.constant 64 : index
    %c0_24 = arith.constant 0 : index
    %45 = vector.load %arg5[%c64, %c0_24] : memref<72x512xf32, #tpu.memory_space<vmem>>, vector<8x512xf32>
    tpu.vector_store %arg5[%c64, %c0_24], %44 {strides = array<i32>} : memref<72x512xf32, #tpu.memory_space<vmem>>, vector<8x512xf32>,
    %c0_25 = arith.constant 0 : index
    %c0_26 = arith.constant 0 : index
    %46 = vector.load %arg5[%c0_25, %c0_26] : memref<72x512xf32, #tpu.memory_space<vmem>>, vector<72x512xf32>
    %cst = arith.constant dense<0.000000e+00> : vector<8x512xf32>
    %47 = tpu.matmul %1, %46, %cst {dimension_numbers = #tpu.dot_dimension_numbers<[1], [0], [0], [1], [0, 0, 1, 1], [], []>} : vector<8x72xf32>, vector<72x512xf32>, vector<8x512xf32> -> vector<8x512xf32>
    %48 = vector.extract_strided_slice %4 {offsets = [0, 0], sizes = [8, 1], strides = [1, 1]} : vector<8x3xf32> to vector<8x1xf32>
    %49 = vector.broadcast %48 : vector<8x1xf32> to vector<8x512xf32>
    %50 = arith.addf %47, %49 : vector<8x512xf32>
    %cst_27 = arith.constant 0.000000e+00 : f32
    %51 = vector.broadcast %cst_27 : f32 to vector<8x512xf32>
    %52 = arith.maximumf %50, %51 : vector<8x512xf32>
    %c17_i32 = arith.constant 17 : i32
    %53 = tpu.dynamic_rotate %52 by %c17_i32 dim 1 : vector<8x512xf32>, i32 -> vector<8x512xf32>
    %c8_28 = arith.constant 8 : index
    %c0_29 = arith.constant 0 : index
    %54 = vector.load %arg3[%c8_28, %c0_29] : memref<16x512xf32, #tpu.memory_space<vmem>>, vector<1x512xf32>
    %55 = vector.broadcast %54 : vector<1x512xf32> to vector<8x512xf32>
    %56 = arith.mulf %53, %55 : vector<8x512xf32>
    %c0_30 = arith.constant 0 : index
    %c0_31 = arith.constant 0 : index
    %57 = vector.load %arg6[%c0_30, %c0_31] : memref<72x512xf32, #tpu.memory_space<vmem>>, vector<8x512xf32>
    tpu.vector_store %arg6[%c0_30, %c0_31], %56 {strides = array<i32>} : memref<72x512xf32, #tpu.memory_space<vmem>>, vector<8x512xf32>,
    %c16_i32 = arith.constant 16 : i32
    %58 = tpu.dynamic_rotate %52 by %c16_i32 dim 1 : vector<8x512xf32>, i32 -> vector<8x512xf32>
    %c9 = arith.constant 9 : index
    %c0_32 = arith.constant 0 : index
    %59 = vector.load %arg3[%c9, %c0_32] : memref<16x512xf32, #tpu.memory_space<vmem>>, vector<1x512xf32>
    %60 = vector.broadcast %59 : vector<1x512xf32> to vector<8x512xf32>
    %61 = arith.mulf %58, %60 : vector<8x512xf32>
    %c8_33 = arith.constant 8 : index
    %c0_34 = arith.constant 0 : index
    %62 = vector.load %arg6[%c8_33, %c0_34] : memref<72x512xf32, #tpu.memory_space<vmem>>, vector<8x512xf32>
    tpu.vector_store %arg6[%c8_33, %c0_34], %61 {strides = array<i32>} : memref<72x512xf32, #tpu.memory_space<vmem>>, vector<8x512xf32>,
    %c15_i32 = arith.constant 15 : i32
    %63 = tpu.dynamic_rotate %52 by %c15_i32 dim 1 : vector<8x512xf32>, i32 -> vector<8x512xf32>
    %c10 = arith.constant 10 : index
    %c0_35 = arith.constant 0 : index
    %64 = vector.load %arg3[%c10, %c0_35] : memref<16x512xf32, #tpu.memory_space<vmem>>, vector<1x512xf32>
    %65 = vector.broadcast %64 : vector<1x512xf32> to vector<8x512xf32>
    %66 = arith.mulf %63, %65 : vector<8x512xf32>
    %c16_36 = arith.constant 16 : index
    %c0_37 = arith.constant 0 : index
    %67 = vector.load %arg6[%c16_36, %c0_37] : memref<72x512xf32, #tpu.memory_space<vmem>>, vector<8x512xf32>
    tpu.vector_store %arg6[%c16_36, %c0_37], %66 {strides = array<i32>} : memref<72x512xf32, #tpu.memory_space<vmem>>, vector<8x512xf32>,
    %c1_i32 = arith.constant 1 : i32
    %68 = tpu.dynamic_rotate %52 by %c1_i32 dim 1 : vector<8x512xf32>, i32 -> vector<8x512xf32>
    %c11 = arith.constant 11 : index
    %c0_38 = arith.constant 0 : index
    %69 = vector.load %arg3[%c11, %c0_38] : memref<16x512xf32, #tpu.memory_space<vmem>>, vector<1x512xf32>
    %70 = vector.broadcast %69 : vector<1x512xf32> to vector<8x512xf32>
    %71 = arith.mulf %68, %70 : vector<8x512xf32>
    %c24_39 = arith.constant 24 : index
    %c0_40 = arith.constant 0 : index
    %72 = vector.load %arg6[%c24_39, %c0_40] : memref<72x512xf32, #tpu.memory_space<vmem>>, vector<8x512xf32>
    tpu.vector_store %arg6[%c24_39, %c0_40], %71 {strides = array<i32>} : memref<72x512xf32, #tpu.memory_space<vmem>>, vector<8x512xf32>,
    %c32_41 = arith.constant 32 : index
    %c0_42 = arith.constant 0 : index
    %73 = vector.load %arg6[%c32_41, %c0_42] : memref<72x512xf32, #tpu.memory_space<vmem>>, vector<8x512xf32>
    tpu.vector_store %arg6[%c32_41, %c0_42], %52 {strides = array<i32>} : memref<72x512xf32, #tpu.memory_space<vmem>>, vector<8x512xf32>,
    %c511_i32 = arith.constant 511 : i32
    %74 = tpu.dynamic_rotate %52 by %c511_i32 dim 1 : vector<8x512xf32>, i32 -> vector<8x512xf32>
    %c12 = arith.constant 12 : index
    %c0_43 = arith.constant 0 : index
    %75 = vector.load %arg3[%c12, %c0_43] : memref<16x512xf32, #tpu.memory_space<vmem>>, vector<1x512xf32>
    %76 = vector.broadcast %75 : vector<1x512xf32> to vector<8x512xf32>
    %77 = arith.mulf %74, %76 : vector<8x512xf32>
    %c40_44 = arith.constant 40 : index
    %c0_45 = arith.constant 0 : index
    %78 = vector.load %arg6[%c40_44, %c0_45] : memref<72x512xf32, #tpu.memory_space<vmem>>, vector<8x512xf32>
    tpu.vector_store %arg6[%c40_44, %c0_45], %77 {strides = array<i32>} : memref<72x512xf32, #tpu.memory_space<vmem>>, vector<8x512xf32>,
    %c497_i32 = arith.constant 497 : i32
    %79 = tpu.dynamic_rotate %52 by %c497_i32 dim 1 : vector<8x512xf32>, i32 -> vector<8x512xf32>
    %c13 = arith.constant 13 : index
    %c0_46 = arith.constant 0 : index
    %80 = vector.load %arg3[%c13, %c0_46] : memref<16x512xf32, #tpu.memory_space<vmem>>, vector<1x512xf32>
    %81 = vector.broadcast %80 : vector<1x512xf32> to vector<8x512xf32>
    %82 = arith.mulf %79, %81 : vector<8x512xf32>
    %c48_47 = arith.constant 48 : index
    %c0_48 = arith.constant 0 : index
    %83 = vector.load %arg6[%c48_47, %c0_48] : memref<72x512xf32, #tpu.memory_space<vmem>>, vector<8x512xf32>
    tpu.vector_store %arg6[%c48_47, %c0_48], %82 {strides = array<i32>} : memref<72x512xf32, #tpu.memory_space<vmem>>, vector<8x512xf32>,
    %c496_i32 = arith.constant 496 : i32
    %84 = tpu.dynamic_rotate %52 by %c496_i32 dim 1 : vector<8x512xf32>, i32 -> vector<8x512xf32>
    %c14 = arith.constant 14 : index
    %c0_49 = arith.constant 0 : index
    %85 = vector.load %arg3[%c14, %c0_49] : memref<16x512xf32, #tpu.memory_space<vmem>>, vector<1x512xf32>
    %86 = vector.broadcast %85 : vector<1x512xf32> to vector<8x512xf32>
    %87 = arith.mulf %84, %86 : vector<8x512xf32>
    %c56_50 = arith.constant 56 : index
    %c0_51 = arith.constant 0 : index
    %88 = vector.load %arg6[%c56_50, %c0_51] : memref<72x512xf32, #tpu.memory_space<vmem>>, vector<8x512xf32>
    tpu.vector_store %arg6[%c56_50, %c0_51], %87 {strides = array<i32>} : memref<72x512xf32, #tpu.memory_space<vmem>>, vector<8x512xf32>,
    %c495_i32 = arith.constant 495 : i32
    %89 = tpu.dynamic_rotate %52 by %c495_i32 dim 1 : vector<8x512xf32>, i32 -> vector<8x512xf32>
    %c15 = arith.constant 15 : index
    %c0_52 = arith.constant 0 : index
    %90 = vector.load %arg3[%c15, %c0_52] : memref<16x512xf32, #tpu.memory_space<vmem>>, vector<1x512xf32>
    %91 = vector.broadcast %90 : vector<1x512xf32> to vector<8x512xf32>
    %92 = arith.mulf %89, %91 : vector<8x512xf32>
    %c64_53 = arith.constant 64 : index
    %c0_54 = arith.constant 0 : index
    %93 = vector.load %arg6[%c64_53, %c0_54] : memref<72x512xf32, #tpu.memory_space<vmem>>, vector<8x512xf32>
    tpu.vector_store %arg6[%c64_53, %c0_54], %92 {strides = array<i32>} : memref<72x512xf32, #tpu.memory_space<vmem>>, vector<8x512xf32>,
    %c0_55 = arith.constant 0 : index
    %c0_56 = arith.constant 0 : index
    %94 = vector.load %arg6[%c0_55, %c0_56] : memref<72x512xf32, #tpu.memory_space<vmem>>, vector<72x512xf32>
    %cst_57 = arith.constant dense<0.000000e+00> : vector<8x512xf32>
    %95 = tpu.matmul %2, %94, %cst_57 {dimension_numbers = #tpu.dot_dimension_numbers<[1], [0], [0], [1], [0, 0, 1, 1], [], []>} : vector<8x72xf32>, vector<72x512xf32>, vector<8x512xf32> -> vector<8x512xf32>
    %96 = vector.extract_strided_slice %4 {offsets = [0, 1], sizes = [8, 1], strides = [1, 1]} : vector<8x3xf32> to vector<8x1xf32>
    %97 = vector.broadcast %96 : vector<8x1xf32> to vector<8x512xf32>
    %98 = arith.addf %95, %97 : vector<8x512xf32>
    %cst_58 = arith.constant dense<0.000000e+00> : vector<8x512xf32>
    %99 = tpu.matmul %3, %0, %cst_58 {dimension_numbers = #tpu.dot_dimension_numbers<[1], [0], [0], [1], [0, 0, 1, 1], [], []>} : vector<8x8xf32>, vector<8x512xf32>, vector<8x512xf32> -> vector<8x512xf32>
    %100 = vector.extract_strided_slice %4 {offsets = [0, 2], sizes = [8, 1], strides = [1, 1]} : vector<8x3xf32> to vector<8x1xf32>
    %101 = vector.broadcast %100 : vector<8x1xf32> to vector<8x512xf32>
    %102 = arith.addf %99, %101 : vector<8x512xf32>
    %103 = arith.addf %98, %102 : vector<8x512xf32>
    %cst_59 = arith.constant 0.000000e+00 : f32
    %104 = vector.broadcast %cst_59 : f32 to vector<8x512xf32>
    %105 = arith.maximumf %103, %104 : vector<8x512xf32>
    %c0_60 = arith.constant 0 : index
    %c0_61 = arith.constant 0 : index
    %106 = vector.load %arg4[%c0_60, %c0_61] : memref<8x512xf32, #tpu.memory_space<vmem>>, vector<8x512xf32>
    tpu.vector_store %arg4[%c0_60, %c0_61], %105 {strides = array<i32>} : memref<8x512xf32, #tpu.memory_space<vmem>>, vector<8x512xf32>,
    return
  }
  func.func @transform_0(%arg0: i32) -> (i32, i32) {
    %c0_i32 = arith.constant 0 : i32
    %c0_i32_0 = arith.constant 0 : i32
    return %c0_i32, %arg0 : i32, i32
  }
  func.func @transform_1(%arg0: i32) -> (i32, i32) {
    %c0_i32 = arith.constant 0 : i32
    %c0_i32_0 = arith.constant 0 : i32
    %c0_i32_1 = arith.constant 0 : i32
    return %c0_i32, %c0_i32_0 : i32, i32
  }
  func.func @transform_2(%arg0: i32) -> (i32, i32) {
    %c0_i32 = arith.constant 0 : i32
    %c0_i32_0 = arith.constant 0 : i32
    %c0_i32_1 = arith.constant 0 : i32
    return %c0_i32, %c0_i32_0 : i32, i32
  }
  func.func @transform_3(%arg0: i32) -> (i32, i32) {
    %c0_i32 = arith.constant 0 : i32
    %c0_i32_0 = arith.constant 0 : i32
    return %c0_i32, %arg0 : i32, i32
  }
}

</mosaic_0001>

<bundles_post_ra>
// kernel: residual_block_pallas.1
= control target key start
LH: loop header
LB: loop body
LE: loop exit
PB: predicated region body
PF: predicated region fallthrough
CT: control target
= control target key end

     0   :  { %s1322_s16 = smov 94   ;;  %s1323_s21 = smov 96   ;;  %v1329_v4 = vmov 0.0   ;;  %v1330_v5 = vmov 0   ;;  %v30_v7 = vlaneseq  ;;  %vm420_vm8 = vcmask 588800   ;;  %s1731_s0 = inlined_call_operand.vmem [shape: f32[8,512], index: 0, kind: input, shape index: {}]   ;;  %s1732_s1 = inlined_call_operand.vmem [shape: f32[8,512], index: 1, kind: input, shape index: {}]   ;;  %s1733_s2 = inlined_call_operand.vmem [shape: f32[16,512], index: 2, kind: input, shape index: {}]   ;;  %s1734_s3 = inlined_call_operand.vmem [shape: f32[8,512], index: 3, kind: output, shape index: {}]  }
   0x1   :  { %v1365_v0 = vld [vmem:[%s1731_s0 + $0x10] sm:$0xff]  ;;  %v1370_v1 = vld [vmem:[%s1731_s0] sm:$0xff]  ;;  %v1377_v2 = vld [vmem:[%s1731_s0 + $0x18] sm:$0xff]  ;;  %s1324_s22 = smov 98   ;;  %s1326_s23 = smov 2   ;;  %488 = vmatprep.mubr.f32.mxu0 %v1329_v4  ;;  %559 = vmatprep.mubr.f32.mxu1 %v1329_v4 }
   0x2   :  { %339 = vrot.lane.b32.xlu1 %v1365_v0, %s1322_s16  ;;  %335 = vrot.lane.b32.xlu0 %v1370_v1, %s1322_s16  ;;  %v1382_v3 = vld [vmem:[%s1731_s0 + $0x8] sm:$0xff]  ;;  %s1325_s0 = smov 126   ;;  %s1327_s24 = smov 30   ;;  %v1419_v6 = vld [vmem:[%s1732_s1 + $0x18] sm:$0xff]  ;;  %v40_v8 = vshrl.u32 %v30_v7, 7  ;;  %v1422_v9 = vand.u32 127, %v30_v7 }
   0x3   :  { %s1328_s25 = smov 32   ;;  %1318 = vset.pattern.permute.xlu0 %v1330_v5  ;;  %s1331_s26 = smov 34   ;;  %v1283_v14 = vld [vmem:[%s1733_s2 + $0x7] ss:$8 sm:$0xf] }
   0x4   :  { %v1424_v10 = vsub.s32 1, %v40_v8  ;;  %v1426_v11 = vsub.s32 3, %v40_v8  ;;  %v1428_v12 = vsub.s32 0, %v40_v8  ;;  %v1430_v13 = vsub.s32 2, %v40_v8  ;;  %s1332_s20 = smov 111  }
   0x5   :  { %vm343_vm0 = vcmp.lt.s32.totalorder %v1422_v9, 94  ;;  %v1282_v32 = vld [vmem:[%s1733_s2 + $0x6] ss:$8 sm:$0xf]  ;;  %vm299_vm1 = vcmp.lt.s32.totalorder %v1422_v9, 96  ;;  %vm255_vm2 = vcmp.lt.s32.totalorder %v1422_v9, 98 }
   0x6   :  { %341 = vrot.lane.b32.xlu1 %v1377_v2, %s1322_s16  ;;  %337 = vrot.lane.b32.xlu0 %v1382_v3, %s1322_s16  ;;  %v358_v17 = vrot.slane %v1283_v14, %v1424_v10  ;;  %v366_v18 = vrot.slane %v1283_v14, %v1426_v11  ;;  %v354_v19 = vrot.slane %v1283_v14, %v1428_v12  ;;  %v1281_v49 = vld [vmem:[%s1733_s2 + $0x5] ss:$8 sm:$0xf]  ;;  %v1280_v8 = vld [vmem:[%s1733_s2 + $0x4] ss:$8 sm:$0xf] }
   0x7   :  { %v362_v20 = vrot.slane %v1283_v14, %v1430_v13  ;;  %v322_v34 = vrot.slane %v1282_v32, %v1426_v11  ;;  %v314_v35 = vrot.slane %v1282_v32, %v1424_v10  ;;  %v318_v36 = vrot.slane %v1282_v32, %v1430_v13 }
   0x8   :  { %v310_v37 = vrot.slane %v1282_v32, %v1428_v12  ;;  %v278_v51 = vrot.slane %v1281_v49, %v1426_v11  ;;  %v270_v52 = vrot.slane %v1281_v49, %v1424_v10  ;;  %v274_v53 = vrot.slane %v1281_v49, %v1430_v13 }
   0x9   :  { %v266_v54 = vrot.slane %v1281_v49, %v1428_v12  ;;  %vm211_vm3 = vcmp.lt.s32.totalorder %v1422_v9, 126  ;;  %vm163_vm4 = vcmp.lt.s32.totalorder %v1422_v9, 2  ;;  %vm119_vm5 = vcmp.lt.s32.totalorder %v1422_v9, 30 }
   0xa   :  { %293 = vrot.lane.b32.xlu1 %v1382_v3, %s1323_s21  ;;  %291 = vrot.lane.b32.xlu0 %v1370_v1, %s1323_s21  ;;  %vm75_vm6 = vcmp.lt.s32.totalorder %v1422_v9, 32  ;;  %vm32_vm7 = vcmp.lt.s32.totalorder %v1422_v9, 34  ;;  %vm890_vm9 = vcmp.lt.s32.totalorder %v1422_v9, 111  ;;  %vm846_vm10 = vcmp.lt.s32.totalorder %v1422_v9, 112 }
   0xb   :  { %vm802_vm11 = vcmp.lt.s32.totalorder %v1422_v9, 113  ;;  %vm758_vm12 = vcmp.lt.s32.totalorder %v1422_v9, 127  ;;  %vm710_vm13 = vcmp.lt.s32.totalorder %v1422_v9, 1  ;;  %vm666_vm14 = vcmp.lt.s32.totalorder %v1422_v9, 15 }
   0xc   :  { %vm622_vm15 = vcmp.lt.s32.totalorder %v1422_v9, 16 }
   0xe   :  { %297 = vrot.lane.b32.xlu1 %v1377_v2, %s1323_s21  ;;  %295 = vrot.lane.b32.xlu0 %v1365_v0, %s1323_s21  ;;  %s1333_s21 = smov 112  }
  0x12   :  { %249 = vrot.lane.b32.xlu1 %v1382_v3, %s1324_s22  ;;  %247 = vrot.lane.b32.xlu0 %v1370_v1, %s1324_s22 }
  0x16   :  { %253 = vrot.lane.b32.xlu1 %v1377_v2, %s1324_s22  ;;  %251 = vrot.lane.b32.xlu0 %v1365_v0, %s1324_s22  ;;  %s1334_s22 = smov 113  }
  0x1a   :  { %205 = vrot.lane.b32.xlu1 %v1382_v3, %s1325_s0  ;;  %203 = vrot.lane.b32.xlu0 %v1370_v1, %s1325_s0 }
  0x1e   :  { %209 = vrot.lane.b32.xlu1 %v1377_v2, %s1325_s0  ;;  %207 = vrot.lane.b32.xlu0 %v1365_v0, %s1325_s0  ;;  %s1335_s0 = smov 127  }
  0x22   :  { %157 = vrot.lane.b32.xlu1 %v1382_v3, %s1326_s23  ;;  %155 = vrot.lane.b32.xlu0 %v1370_v1, %s1326_s23 }
  0x26   :  { %161 = vrot.lane.b32.xlu1 %v1377_v2, %s1326_s23  ;;  %159 = vrot.lane.b32.xlu0 %v1365_v0, %s1326_s23  ;;  %s1336_s23 = smov 1  }
  0x2a   :  { %113 = vrot.lane.b32.xlu1 %v1382_v3, %s1327_s24  ;;  %111 = vrot.lane.b32.xlu0 %v1370_v1, %s1327_s24 }
  0x2e   :  { %117 = vrot.lane.b32.xlu1 %v1377_v2, %s1327_s24  ;;  %115 = vrot.lane.b32.xlu0 %v1365_v0, %s1327_s24  ;;  %s1337_s24 = smov 15  }
  0x32   :  { %69 = vrot.lane.b32.xlu1 %v1382_v3, %s1328_s25  ;;  %67 = vrot.lane.b32.xlu0 %v1370_v1, %s1328_s25 }
  0x36   :  { %73 = vrot.lane.b32.xlu1 %v1377_v2, %s1328_s25  ;;  %71 = vrot.lane.b32.xlu0 %v1365_v0, %s1328_s25  ;;  %s1338_s25 = smov 16  }
  0x3a   :  { %24 = vrot.lane.b32.xlu1 %v1382_v3, %s1331_s26  ;;  %22 = vrot.lane.b32.xlu0 %v1370_v1, %s1331_s26 }
  0x3e   :  { %28 = vrot.lane.b32.xlu1 %v1377_v2, %s1331_s26  ;;  %26 = vrot.lane.b32.xlu0 %v1365_v0, %s1331_s26  ;;  %s1339_s26 = smov 17  }
  0x42   :  { %417 = vperm.xlu0 %1318, %v1419_v6  }
  0x74   :  { %v340_v15 = vpop.permute.xlu1 %339  ;;  %v336_v16 = vpop.permute.xlu0 %335 }
  0x78   :  { %v342_v21 = vpop.permute.xlu1 %341  ;;  %v338_v22 = vpop.permute.xlu0 %337 }
  0x79   :  { %v344_v23 = vsel %vm343_vm0, %v340_v15, %v342_v21  ;;  %v346_v24 = vsel %vm343_vm0, %v336_v16, %v338_v22  ;;  %v345_v25 = vsel %vm343_vm0, %v338_v22, %v340_v15  ;;  %v347_v26 = vsel %vm343_vm0, %v342_v21, %v336_v16 }
  0x7a   :  { %v372_v27 = vmul.f32 %v358_v17, %v345_v25  ;;  %v374_v28 = vmul.f32 %v366_v18, %v347_v26  ;;  %v371_v29 = vmul.f32 %v354_v19, %v346_v24  ;;  %v373_v30 = vmul.f32 %v362_v20, %v344_v23  ;;  %v1279_v19 = vld [vmem:[%s1733_s2 + $0x3] ss:$8 sm:$0xf] }
  0x7b   :  { %v234_v15 = vrot.slane %v1280_v8, %v1426_v11  ;;  %v226_v16 = vrot.slane %v1280_v8, %v1424_v10  ;;  %v230_v17 = vrot.slane %v1280_v8, %v1430_v13  ;;  %v222_v18 = vrot.slane %v1280_v8, %v1428_v12 }
  0x7c   :  { %v294_v31 = vpop.permute.xlu1 %293  ;;  %438 = vmatprep.subr.mxu0 %v372_v27  ;;  %509 = vmatprep.subr.mxu1 %v374_v28  ;;  %v292_v33 = vpop.permute.xlu0 %291  ;;  %vm578_vm0 = vcmp.lt.s32.totalorder %v1422_v9, 17  ;;  %v20_v9 = vld [vmem:[%s1732_s1 + $0x10] sm:$0xff] }
  0x7d   :  { %439 = vmatpush1.msra.mxu0 %v371_v29  ;;  %510 = vmatpush1.msra.mxu1 %v373_v30  ;;  %v302_v38 = vsel %vm299_vm1, %v292_v33, %v294_v31  ;;  %v178_v29 = vrot.slane %v1279_v19, %v1424_v10 }
  0x7e   :  { %v327_v47 = vmul.f32 %v310_v37, %v302_v38  ;;  %v186_v37 = vrot.slane %v1279_v19, %v1426_v11  ;;  %v1278_v38 = vld [vmem:[%s1733_s2 + $0x2] ss:$8 sm:$0xf] }
  0x80   :  { %v298_v39 = vpop.permute.xlu1 %297  ;;  %v296_v40 = vpop.permute.xlu0 %295 }
  0x81   :  { %v303_v41 = vsel %vm299_vm1, %v298_v39, %v292_v33  ;;  %v300_v42 = vsel %vm299_vm1, %v296_v40, %v298_v39  ;;  %v301_v43 = vsel %vm299_vm1, %v294_v31, %v296_v40  ;;  %vm1115_vm1 = vcmask 64512  }
  0x82   :  { %v330_v44 = vmul.f32 %v322_v34, %v303_v41  ;;  %v328_v45 = vmul.f32 %v314_v35, %v301_v43  ;;  %v329_v46 = vmul.f32 %v318_v36, %v300_v42  ;;  %v174_v34 = vrot.slane %v1279_v19, %v1428_v12 }
  0x83   :  { %v182_v36 = vrot.slane %v1279_v19, %v1430_v13  ;;  %v37_v19 = vld [vmem:[%s1733_s2] ss:$8 sm:$0xf] }
  0x84   :  { %v250_v48 = vpop.permute.xlu1 %249  ;;  %440 = vmatprep.subr.mxu0 %v328_v45  ;;  %511 = vmatprep.subr.mxu1 %v330_v44  ;;  %v248_v50 = vpop.permute.xlu0 %247 }
  0x85   :  { %441 = vmatpush1.msra.mxu0 %v327_v47  ;;  %512 = vmatpush1.msra.mxu1 %v329_v46  ;;  %v258_v55 = vsel %vm255_vm2, %v248_v50, %v250_v48  ;;  %v134_v47 = vrot.slane %v1278_v38, %v1424_v10 }
  0x86   :  { %v283_v5 = vmul.f32 %v266_v54, %v258_v55  ;;  %v142_v54 = vrot.slane %v1278_v38, %v1426_v11  ;;  %v1277_v55 = vld [vmem:[%s1733_s2 + $0x1] ss:$8 sm:$0xf] }
  0x88   :  { %v254_v56 = vpop.permute.xlu1 %253  ;;  %v252_v57 = vpop.permute.xlu0 %251 }
  0x89   :  { %v259_v58 = vsel %vm255_vm2, %v254_v56, %v248_v50  ;;  %v256_v59 = vsel %vm255_vm2, %v252_v57, %v254_v56  ;;  %v257_v60 = vsel %vm255_vm2, %v250_v48, %v252_v57 }
  0x8a   :  { %v286_v61 = vmul.f32 %v278_v51, %v259_v58  ;;  %v284_v62 = vmul.f32 %v270_v52, %v257_v60  ;;  %v285_v63 = vmul.f32 %v274_v53, %v256_v59  ;;  %v130_v52 = vrot.slane %v1278_v38, %v1428_v12 }
  0x8b   :  { %v138_v53 = vrot.slane %v1278_v38, %v1430_v13 }
  0x8c   :  { %v206_v7 = vpop.permute.xlu1 %205  ;;  %442 = vmatprep.subr.mxu0 %v284_v62  ;;  %513 = vmatprep.subr.mxu1 %v286_v61  ;;  %v204_v14 = vpop.permute.xlu0 %203 }
  0x8d   :  { %443 = vmatpush1.msra.mxu0 %v283_v5  ;;  %514 = vmatpush1.msra.mxu1 %v285_v63  ;;  %v214_v20 = vsel %vm211_vm3, %v204_v14, %v206_v7  ;;  %v90_v5 = vrot.slane %v1277_v55, %v1424_v10 }
  0x8e   :  { %v239_v30 = vmul.f32 %v222_v18, %v214_v20  ;;  %v98_v18 = vrot.slane %v1277_v55, %v1426_v11 }
  0x90   :  { %v210_v21 = vpop.permute.xlu1 %209  ;;  %v208_v22 = vpop.permute.xlu0 %207 }
  0x91   :  { %v215_v23 = vsel %vm211_vm3, %v210_v21, %v204_v14  ;;  %v212_v24 = vsel %vm211_vm3, %v208_v22, %v210_v21  ;;  %v213_v25 = vsel %vm211_vm3, %v206_v7, %v208_v22 }
  0x92   :  { %v242_v26 = vmul.f32 %v234_v15, %v215_v23  ;;  %v240_v27 = vmul.f32 %v226_v16, %v213_v25  ;;  %v241_v28 = vmul.f32 %v230_v17, %v212_v24  ;;  %v86_v16 = vrot.slane %v1277_v55, %v1428_v12 }
  0x93   :  { %v94_v17 = vrot.slane %v1277_v55, %v1430_v13 }
  0x94   :  { %v158_v31 = vpop.permute.xlu1 %157  ;;  %444 = vmatprep.subr.mxu0 %v240_v27  ;;  %515 = vmatprep.subr.mxu1 %v242_v26  ;;  %v156_v32 = vpop.permute.xlu0 %155 }
  0x95   :  { %v166_v33 = vsel %vm163_vm4, %v156_v32, %v158_v31  ;;  %445 = vmatpush1.msra.mxu0 %v239_v30  ;;  %516 = vmatpush1.msra.mxu1 %v241_v28  ;;  %v46_v28 = vrot.slane %v37_v19, %v1424_v10 }
  0x96   :  { %v192_v35 = vmul.f32 %v178_v29, %v166_v33  ;;  %446 = vmatprep.subr.mxu0 %v1382_v3  ;;  %517 = vmatprep.subr.mxu1 %v1377_v2  ;;  %v42_v33 = vrot.slane %v37_v19, %v1428_v12 }
  0x97   :  { %447 = vmatpush1.msra.mxu0 %v1370_v1  ;;  %518 = vmatpush1.msra.mxu1 %v1365_v0 }
  0x98   :  { %v162_v39 = vpop.permute.xlu1 %161  ;;  %448 = vmatprep.subr.mxu0 %v192_v35  ;;  %v160_v40 = vpop.permute.xlu0 %159  ;;  %v54_v35 = vrot.slane %v37_v19, %v1426_v11 }
  0x99   :  { %v167_v41 = vsel %vm163_vm4, %v162_v39, %v156_v32  ;;  %v164_v42 = vsel %vm163_vm4, %v160_v40, %v162_v39  ;;  %v165_v43 = vsel %vm163_vm4, %v158_v31, %v160_v40 }
  0x9a   :  { %v191_v44 = vmul.f32 %v174_v34, %v167_v41  ;;  %v193_v45 = vmul.f32 %v182_v36, %v165_v43  ;;  %v194_v46 = vmul.f32 %v186_v37, %v164_v42  ;;  %v50_v34 = vrot.slane %v37_v19, %v1430_v13  ;;  %v1292_v19 = vld [vmem:[%s1733_s2 + $0x26] ss:$8 sm:$0xf] }
  0x9c   :  { %v114_v48 = vpop.permute.xlu1 %113  ;;  %449 = vmatpush1.msra.mxu0 %v191_v44  ;;  %519 = vmatprep.subr.mxu1 %v194_v46  ;;  %v112_v49 = vpop.permute.xlu0 %111  ;;  %v18_v44 = vld [vmem:[%s1732_s1] sm:$0xff] }
  0x9d   :  { %v122_v50 = vsel %vm119_vm5, %v112_v49, %v114_v48  ;;  %520 = vmatpush1.msra.mxu1 %v193_v45 }
  0x9e   :  { %v148_v51 = vmul.f32 %v134_v47, %v122_v50 }
  0xa0   :  { %v118_v56 = vpop.permute.xlu1 %117  ;;  %450 = vmatprep.subr.mxu0 %v148_v51  ;;  %v116_v57 = vpop.permute.xlu0 %115 }
  0xa1   :  { %v123_v58 = vsel %vm119_vm5, %v118_v56, %v112_v49  ;;  %v120_v59 = vsel %vm119_vm5, %v116_v57, %v118_v56  ;;  %v121_v60 = vsel %vm119_vm5, %v114_v48, %v116_v57 }
  0xa2   :  { %v147_v61 = vmul.f32 %v130_v52, %v123_v58  ;;  %v149_v62 = vmul.f32 %v138_v53, %v121_v60  ;;  %v150_v63 = vmul.f32 %v142_v54, %v120_v59  ;;  %v1340_v58 = vmov 1   ;;  %v1293_v60 = vld [vmem:[%s1733_s2 + $0x27] ss:$8 sm:$0xf] }
  0xa3   :  { %1319 = vset.pattern.permute.xlu0 %v1340_v58  ;;  %v1341_v59 = vmov 2  }
  0xa4   :  { %v70_v7 = vpop.permute.xlu1 %69  ;;  %451 = vmatpush1.msra.mxu0 %v147_v61  ;;  %521 = vmatprep.subr.mxu1 %v150_v63  ;;  %v68_v8 = vpop.permute.xlu0 %67  ;;  %v901_v63 = vrot.slane %v1293_v60, %v1428_v12 }
  0xa5   :  { %v78_v14 = vsel %vm75_vm6, %v68_v8, %v70_v7  ;;  %522 = vmatpush1.msra.mxu1 %v149_v62  ;;  %1320 = vset.pattern.permute.xlu1 %v1341_v59 }
  0xa6   :  { %v104_v15 = vmul.f32 %v90_v5, %v78_v14  ;;  %v905_v5 = vrot.slane %v1293_v60, %v1424_v10 }
  0xa8   :  { %v74_v20 = vpop.permute.xlu1 %73  ;;  %452 = vmatprep.subr.mxu0 %v104_v15  ;;  %v72_v21 = vpop.permute.xlu0 %71 }
  0xa9   :  { %v79_v22 = vsel %vm75_vm6, %v74_v20, %v68_v8  ;;  %v76_v23 = vsel %vm75_vm6, %v72_v21, %v74_v20  ;;  %v77_v24 = vsel %vm75_vm6, %v70_v7, %v72_v21 }
  0xaa   :  { %v103_v25 = vmul.f32 %v86_v16, %v79_v22  ;;  %v105_v26 = vmul.f32 %v94_v17, %v77_v24  ;;  %v106_v27 = vmul.f32 %v98_v18, %v76_v23  ;;  %v913_v18 = vrot.slane %v1293_v60, %v1426_v11 }
  0xac   :  { %v25_v29 = vpop.permute.xlu1 %24  ;;  %453 = vmatpush1.msra.mxu0 %v103_v25  ;;  %523 = vmatprep.subr.mxu1 %v106_v27  ;;  %v23_v30 = vpop.permute.xlu0 %22  ;;  %v861_v27 = vrot.slane %v1292_v19, %v1424_v10 }
  0xad   :  { %v35_v31 = vsel %vm32_vm7, %v23_v30, %v25_v29  ;;  %524 = vmatpush1.msra.mxu1 %v105_v26  ;;  %v857_v26 = vrot.slane %v1292_v19, %v1428_v12 }
  0xae   :  { %v60_v32 = vmul.f32 %v46_v28, %v35_v31 }
  0xb0   :  { %v29_v36 = vpop.permute.xlu1 %28  ;;  %454 = vmatprep.subr.mxu0 %v60_v32  ;;  %v27_v37 = vpop.permute.xlu0 %26 }
  0xb1   :  { %v36_v38 = vsel %vm32_vm7, %v29_v36, %v23_v30  ;;  %v33_v39 = vsel %vm32_vm7, %v27_v37, %v29_v36  ;;  %v34_v40 = vsel %vm32_vm7, %v25_v29, %v27_v37  ;;  %v1291_v36 = vld [vmem:[%s1733_s2 + $0x25] ss:$8 sm:$0xf] }
  0xb2   :  { %v59_v41 = vmul.f32 %v42_v33, %v36_v38  ;;  %v61_v42 = vmul.f32 %v50_v34, %v34_v40  ;;  %v62_v43 = vmul.f32 %v54_v35, %v33_v39  ;;  %v865_v34 = vrot.slane %v1292_v19, %v1430_v13 }
  0xb3   :  { %v869_v35 = vrot.slane %v1292_v19, %v1426_v11 }
  0xb4   :  { %455 = vmatpush1.msra.mxu0 %v59_v41  ;;  %525 = vmatprep.subr.mxu1 %v62_v43  ;;  %v813_v43 = vrot.slane %v1291_v36, %v1428_v12 }
  0xb5   :  { %1284 = vmatmul.mubr.msk.f32.vlgmr.msra.gmra.mxu0 %vm420_vm8, %v18_v44  ;;  %526 = vmatpush1.msra.mxu1 %v61_v42 }
  0xb6   :  { %1285 = vmatmul.mubr.msk.f32.vlgmr.msra.gmra.mxu1 %vm420_vm8, %v18_v44  ;;  %1033 = vmatprep.mubr.f32.mxu0 %v1329_v4  ;;  %v817_v44 = vrot.slane %v1291_v36, %v1424_v10 }
  0xb7   :  { %1104 = vmatprep.mubr.f32.mxu1 %v1329_v4 }
  0xbd   :  { %v418_v45 = vpop.permute.xlu0 %417 }
 0x175   :  { %v490_v46 = vpop.f32.mrf.mxu0 }
 0x176   :  { %v491_v47 = vadd.f32 %v490_v46, %v418_v45  ;;  %v561_v48 = vpop.f32.mrf.mxu1 }
 0x177   :  { %v562_v49 = vadd.f32 %v561_v48, %v418_v45  ;;  %v492_v50 = vpop.f32.mrf.mxu0 }
 0x178   :  { %v1539_v51 = vmax.f32 %v491_v47, 0.0  ;;  %v493_v52 = vadd.f32 %v492_v50, %v418_v45  ;;  %v563_v54 = vpop.f32.mrf.mxu1 }
 0x179   :  { %v1541_v53 = vmax.f32 %v562_v49, 0.0  ;;  %v564_v56 = vadd.f32 %v563_v54, %v418_v45  ;;  %v825_v54 = vrot.slane %v1291_v36, %v1426_v11 }
 0x17a   :  { %882 = vrot.lane.b32.xlu1 %v1539_v51, %s1332_s20  ;;  %v1545_v55 = vmax.f32 %v493_v52, 0.0  ;;  %v821_v52 = vrot.slane %v1291_v36, %v1430_v13 }
 0x17b   :  { %886 = vrot.lane.b32.xlu0 %v1541_v53, %s1332_s20  ;;  %v1549_v57 = vmax.f32 %v564_v56, 0.0  ;;  %v1290_v56 = vld [vmem:[%s1733_s2 + $0x24] ss:$8 sm:$0xf] }
 0x17c   :  { %v781_v19 = vrot.slane %v1290_v56, %v1426_v11 }
 0x17e   :  { %884 = vrot.lane.b32.xlu1 %v1545_v55, %s1332_s20 }
 0x17f   :  { %838 = vrot.lane.b32.xlu0 %v1539_v51, %s1333_s21 }
 0x182   :  { %888 = vrot.lane.b32.xlu1 %v1549_v57, %s1332_s20 }
 0x183   :  { %842 = vrot.lane.b32.xlu0 %v1541_v53, %s1333_s21 }
 0x186   :  { %840 = vrot.lane.b32.xlu1 %v1545_v55, %s1333_s21 }
 0x187   :  { %794 = vrot.lane.b32.xlu0 %v1539_v51, %s1334_s22 }
 0x18a   :  { %844 = vrot.lane.b32.xlu1 %v1549_v57, %s1333_s21 }
 0x18b   :  { %798 = vrot.lane.b32.xlu0 %v1541_v53, %s1334_s22 }
 0x18e   :  { %796 = vrot.lane.b32.xlu1 %v1545_v55, %s1334_s22 }
 0x18f   :  { %750 = vrot.lane.b32.xlu0 %v1539_v51, %s1335_s0 }
 0x192   :  { %800 = vrot.lane.b32.xlu1 %v1549_v57, %s1334_s22 }
 0x193   :  { %754 = vrot.lane.b32.xlu0 %v1541_v53, %s1335_s0 }
 0x196   :  { %752 = vrot.lane.b32.xlu1 %v1545_v55, %s1335_s0 }
 0x197   :  { %702 = vrot.lane.b32.xlu0 %v1539_v51, %s1336_s23 }
 0x19a   :  { %756 = vrot.lane.b32.xlu1 %v1549_v57, %s1335_s0 }
 0x19b   :  { %706 = vrot.lane.b32.xlu0 %v1541_v53, %s1336_s23 }
 0x19e   :  { %704 = vrot.lane.b32.xlu1 %v1545_v55, %s1336_s23 }
 0x19f   :  { %658 = vrot.lane.b32.xlu0 %v1539_v51, %s1337_s24 }
 0x1a2   :  { %708 = vrot.lane.b32.xlu1 %v1549_v57, %s1336_s23 }
 0x1a3   :  { %662 = vrot.lane.b32.xlu0 %v1541_v53, %s1337_s24 }
 0x1a6   :  { %660 = vrot.lane.b32.xlu1 %v1545_v55, %s1337_s24 }
 0x1a7   :  { %614 = vrot.lane.b32.xlu0 %v1539_v51, %s1338_s25 }
 0x1aa   :  { %664 = vrot.lane.b32.xlu1 %v1549_v57, %s1337_s24 }
 0x1ab   :  { %618 = vrot.lane.b32.xlu0 %v1541_v53, %s1338_s25 }
 0x1ae   :  { %616 = vrot.lane.b32.xlu1 %v1545_v55, %s1338_s25 }
 0x1af   :  { %570 = vrot.lane.b32.xlu0 %v1539_v51, %s1339_s26 }
 0x1b2   :  { %620 = vrot.lane.b32.xlu1 %v1549_v57, %s1338_s25 }
 0x1b3   :  { %574 = vrot.lane.b32.xlu0 %v1541_v53, %s1339_s26 }
 0x1b6   :  { %572 = vrot.lane.b32.xlu1 %v1545_v55, %s1339_s26 }
 0x1b7   :  { %963 = vperm.xlu0 %1319, %v1419_v6  }
 0x1ba   :  { %576 = vrot.lane.b32.xlu1 %v1549_v57, %s1339_s26 }
 0x1bb   :  { %1321 = vset.pattern.permute.xlu0 %v1341_v59 }
 0x1be   :  { %1112 = vperm.xlu1 %1320, %v1419_v6   ;;  %v909_v6 = vrot.slane %v1293_v60, %v1430_v13 }
 0x1ec   :  { %v883_v61 = vpop.permute.xlu1 %882 }
 0x1ed   :  { %v887_v62 = vpop.permute.xlu0 %886 }
 0x1f0   :  { %v885_v7 = vpop.permute.xlu1 %884 }
 0x1f1   :  { %v892_v8 = vsel %vm890_vm9, %v885_v7, %v887_v62  ;;  %v893_v14 = vsel %vm890_vm9, %v883_v61, %v885_v7  ;;  %v839_v15 = vpop.permute.xlu0 %838  ;;  %v773_v7 = vrot.slane %v1290_v56, %v1424_v10 }
 0x1f2   :  { %v918_v16 = vmul.f32 %v901_v63, %v893_v14  ;;  %v919_v17 = vmul.f32 %v905_v5, %v892_v8  ;;  %v769_v5 = vrot.slane %v1290_v56, %v1428_v12 }
 0x1f4   :  { %983 = vmatprep.subr.mxu0 %v919_v17  ;;  %v889_v20 = vpop.permute.xlu1 %888 }
 0x1f5   :  { %v891_v21 = vsel %vm890_vm9, %v887_v62, %v889_v20  ;;  %v894_v22 = vsel %vm890_vm9, %v889_v20, %v883_v61  ;;  %v843_v23 = vpop.permute.xlu0 %842  ;;  %984 = vmatpush1.msra.mxu0 %v918_v16  ;;  %v1289_v20 = vld [vmem:[%s1733_s2 + $0x23] ss:$8 sm:$0xf] }
 0x1f6   :  { %v920_v24 = vmul.f32 %v909_v6, %v891_v21  ;;  %v921_v25 = vmul.f32 %v913_v18, %v894_v22  ;;  %v777_v18 = vrot.slane %v1290_v56, %v1430_v13 }
 0x1f8   :  { %1054 = vmatprep.subr.mxu1 %v921_v25  ;;  %v841_v28 = vpop.permute.xlu1 %840 }
 0x1f9   :  { %v848_v29 = vsel %vm846_vm10, %v841_v28, %v843_v23  ;;  %v849_v30 = vsel %vm846_vm10, %v839_v15, %v841_v28  ;;  %v795_v31 = vpop.permute.xlu0 %794  ;;  %1055 = vmatpush1.msra.mxu1 %v920_v24 }
 0x1fa   :  { %v874_v32 = vmul.f32 %v857_v26, %v849_v30  ;;  %v875_v33 = vmul.f32 %v861_v27, %v848_v29  ;;  %v725_v27 = vrot.slane %v1289_v20, %v1424_v10 }
 0x1fc   :  { %985 = vmatprep.subr.mxu0 %v875_v33  ;;  %v845_v37 = vpop.permute.xlu1 %844  ;;  %v729_v33 = vrot.slane %v1289_v20, %v1430_v13 }
 0x1fd   :  { %v847_v38 = vsel %vm846_vm10, %v843_v23, %v845_v37  ;;  %v850_v39 = vsel %vm846_vm10, %v845_v37, %v839_v15  ;;  %v799_v40 = vpop.permute.xlu0 %798  ;;  %986 = vmatpush1.msra.mxu0 %v874_v32  ;;  %v721_v32 = vrot.slane %v1289_v20, %v1428_v12 }
 0x1fe   :  { %v876_v41 = vmul.f32 %v865_v34, %v847_v38  ;;  %v877_v42 = vmul.f32 %v869_v35, %v850_v39 }
 0x200   :  { %1056 = vmatprep.subr.mxu1 %v877_v42  ;;  %v797_v45 = vpop.permute.xlu1 %796 }
 0x201   :  { %v804_v46 = vsel %vm802_vm11, %v797_v45, %v799_v40  ;;  %v805_v47 = vsel %vm802_vm11, %v795_v31, %v797_v45  ;;  %v751_v48 = vpop.permute.xlu0 %750  ;;  %1057 = vmatpush1.msra.mxu1 %v876_v41 }
 0x202   :  { %v830_v49 = vmul.f32 %v813_v43, %v805_v47  ;;  %v831_v50 = vmul.f32 %v817_v44, %v804_v46 }
 0x204   :  { %987 = vmatprep.subr.mxu0 %v831_v50  ;;  %v801_v58 = vpop.permute.xlu1 %800 }
 0x205   :  { %v803_v59 = vsel %vm802_vm11, %v799_v40, %v801_v58  ;;  %v806_v60 = vsel %vm802_vm11, %v801_v58, %v795_v31  ;;  %v755_v61 = vpop.permute.xlu0 %754  ;;  %988 = vmatpush1.msra.mxu0 %v830_v49 }
 0x206   :  { %v832_v62 = vmul.f32 %v821_v52, %v803_v59  ;;  %v833_v63 = vmul.f32 %v825_v54, %v806_v60 }
 0x208   :  { %1058 = vmatprep.subr.mxu1 %v833_v63  ;;  %v753_v8 = vpop.permute.xlu1 %752 }
 0x209   :  { %v760_v14 = vsel %vm758_vm12, %v753_v8, %v755_v61  ;;  %v761_v15 = vsel %vm758_vm12, %v751_v48, %v753_v8  ;;  %v703_v16 = vpop.permute.xlu0 %702  ;;  %1059 = vmatpush1.msra.mxu1 %v832_v62 }
 0x20a   :  { %v786_v17 = vmul.f32 %v769_v5, %v761_v15  ;;  %v787_v6 = vmul.f32 %v773_v7, %v760_v14  ;;  %v1286_v15 = vld [vmem:[%s1733_s2 + $0x20] ss:$8 sm:$0xf] }
 0x20c   :  { %989 = vmatprep.subr.mxu0 %v787_v6  ;;  %v757_v21 = vpop.permute.xlu1 %756 }
 0x20d   :  { %v759_v22 = vsel %vm758_vm12, %v755_v61, %v757_v21  ;;  %v762_v23 = vsel %vm758_vm12, %v757_v21, %v751_v48  ;;  %v707_v24 = vpop.permute.xlu0 %706  ;;  %990 = vmatpush1.msra.mxu0 %v786_v17  ;;  %v1287_v48 = vld [vmem:[%s1733_s2 + $0x21] ss:$8 sm:$0xf] }
 0x20e   :  { %v788_v25 = vmul.f32 %v777_v18, %v759_v22  ;;  %v789_v26 = vmul.f32 %v781_v19, %v762_v23  ;;  %991 = vmatprep.subr.mxu0 %v1545_v55  ;;  %v733_v55 = vrot.slane %v1289_v20, %v1426_v11  ;;  %v637_v59 = vrot.slane %v1287_v48, %v1424_v10 }
 0x20f   :  { %992 = vmatpush1.msra.mxu0 %v1539_v51  ;;  %v1288_v51 = vld [vmem:[%s1733_s2 + $0x22] ss:$8 sm:$0xf]  ;;  %v633_v7 = vrot.slane %v1287_v48, %v1428_v12  ;;  %v645_v8 = vrot.slane %v1287_v48, %v1426_v11  ;;  %v641_v14 = vrot.slane %v1287_v48, %v1430_v13  ;;  %v593_v22 = vrot.slane %v1286_v15, %v1424_v10 }
 0x210   :  { %1060 = vmatprep.subr.mxu1 %v789_v26  ;;  %v705_v28 = vpop.permute.xlu1 %704  ;;  %v677_v45 = vrot.slane %v1288_v51, %v1428_v12  ;;  %v689_v46 = vrot.slane %v1288_v51, %v1426_v11  ;;  %v685_v47 = vrot.slane %v1288_v51, %v1430_v13 }
 0x211   :  { %v713_v29 = vsel %vm710_vm13, %v703_v16, %v705_v28  ;;  %v659_v30 = vpop.permute.xlu0 %658  ;;  %1061 = vmatpush1.msra.mxu1 %v788_v25  ;;  %v712_v34 = vsel %vm710_vm13, %v705_v28, %v707_v24  ;;  %v601_v28 = vrot.slane %v1286_v15, %v1426_v11  ;;  %v19_v11 = vld [vmem:[%s1732_s1 + $0x8] sm:$0xff] }
 0x212   :  { %v739_v31 = vmul.f32 %v725_v27, %v713_v29  ;;  %1062 = vmatprep.subr.mxu1 %v1549_v57  ;;  %v740_v40 = vmul.f32 %v729_v33, %v712_v34  ;;  %v589_v27 = vrot.slane %v1286_v15, %v1428_v12 }
 0x213   :  { %1063 = vmatpush1.msra.mxu1 %v1541_v53  ;;  %v681_v53 = vrot.slane %v1288_v51, %v1424_v10 }
 0x214   :  { %993 = vmatprep.subr.mxu0 %v739_v31  ;;  %v709_v35 = vpop.permute.xlu1 %708 }
 0x215   :  { %v711_v57 = vsel %vm710_vm13, %v707_v24, %v709_v35  ;;  %v714_v36 = vsel %vm710_vm13, %v709_v35, %v703_v16  ;;  %v663_v37 = vpop.permute.xlu0 %662 }
 0x216   :  { %v738_v38 = vmul.f32 %v721_v32, %v714_v36  ;;  %v741_v39 = vmul.f32 %v733_v55, %v711_v57 }
 0x218   :  { %994 = vmatpush1.msra.mxu0 %v738_v38  ;;  %1064 = vmatprep.subr.mxu1 %v741_v39  ;;  %v661_v41 = vpop.permute.xlu1 %660 }
 0x219   :  { %v669_v42 = vsel %vm666_vm14, %v659_v30, %v661_v41  ;;  %v615_v43 = vpop.permute.xlu0 %614  ;;  %1065 = vmatpush1.msra.mxu1 %v740_v40  ;;  %v668_v49 = vsel %vm666_vm14, %v661_v41, %v663_v37 }
 0x21a   :  { %v695_v44 = vmul.f32 %v681_v53, %v669_v42  ;;  %v696_v60 = vmul.f32 %v685_v47, %v668_v49 }
 0x21c   :  { %995 = vmatprep.subr.mxu0 %v695_v44  ;;  %v665_v50 = vpop.permute.xlu1 %664 }
 0x21d   :  { %v667_v52 = vsel %vm666_vm14, %v663_v37, %v665_v50  ;;  %v670_v54 = vsel %vm666_vm14, %v665_v50, %v659_v30  ;;  %v619_v61 = vpop.permute.xlu0 %618  ;;  %v597_v30 = vrot.slane %v1286_v15, %v1430_v13 }
 0x21e   :  { %v694_v56 = vmul.f32 %v677_v45, %v670_v54  ;;  %v697_v58 = vmul.f32 %v689_v46, %v667_v52 }
 0x220   :  { %996 = vmatpush1.msra.mxu0 %v694_v56  ;;  %1066 = vmatprep.subr.mxu1 %v697_v58  ;;  %v617_v62 = vpop.permute.xlu1 %616 }
 0x221   :  { %v625_v63 = vsel %vm622_vm15, %v615_v43, %v617_v62  ;;  %1067 = vmatpush1.msra.mxu1 %v696_v60  ;;  %v624_v16 = vsel %vm622_vm15, %v617_v62, %v619_v61  ;;  %v571_v6 = vpop.permute.xlu0 %570 }
 0x222   :  { %v651_v5 = vmul.f32 %v637_v59, %v625_v63  ;;  %v652_v23 = vmul.f32 %v641_v14, %v624_v16 }
 0x224   :  { %997 = vmatprep.subr.mxu0 %v651_v5  ;;  %v621_v17 = vpop.permute.xlu1 %620 }
 0x225   :  { %v623_v18 = vsel %vm622_vm15, %v619_v61, %v621_v17  ;;  %v626_v19 = vsel %vm622_vm15, %v621_v17, %v615_v43  ;;  %v575_v29 = vpop.permute.xlu0 %574 }
 0x226   :  { %v650_v20 = vmul.f32 %v633_v7, %v626_v19  ;;  %v653_v21 = vmul.f32 %v645_v8, %v623_v18 }
 0x228   :  { %998 = vmatpush1.msra.mxu0 %v650_v20  ;;  %1068 = vmatprep.subr.mxu1 %v653_v21  ;;  %v573_v24 = vpop.permute.xlu1 %572 }
 0x229   :  { %v581_v25 = vsel %vm578_vm0, %v571_v6, %v573_v24  ;;  %1069 = vmatpush1.msra.mxu1 %v652_v23  ;;  %v580_v31 = vsel %vm578_vm0, %v573_v24, %v575_v29 }
 0x22a   :  { %v607_v26 = vmul.f32 %v593_v22, %v581_v25  ;;  %v608_v12 = vmul.f32 %v597_v30, %v580_v31 }
 0x22c   :  { %999 = vmatprep.subr.mxu0 %v607_v26  ;;  %v577_v10 = vpop.permute.xlu1 %576 }
 0x22d   :  { %v579_v32 = vsel %vm578_vm0, %v575_v29, %v577_v10  ;;  %v582_v55 = vsel %vm578_vm0, %v577_v10, %v571_v6 }
 0x22e   :  { %v606_v33 = vmul.f32 %v589_v27, %v582_v55  ;;  %v609_v51 = vmul.f32 %v601_v28, %v579_v32 }
 0x230   :  { %1000 = vmatpush1.msra.mxu0 %v606_v33  ;;  %1070 = vmatprep.subr.mxu1 %v609_v51 }
 0x231   :  { %1294 = vmatmul.mubr.msk.f32.vlgmr.msra.gmra.mxu0 %vm420_vm8, %v19_v11  ;;  %1071 = vmatpush1.msra.mxu1 %v608_v12 }
 0x232   :  { %1295 = vmatmul.mubr.msk.f32.vlgmr.msra.gmra.mxu1 %vm420_vm8, %v19_v11  ;;  %1149 = vmatprep.subr.mxu0 %v1382_v3  ;;  %v964_v3 = vpop.permute.xlu0 %963 }
 0x233   :  { %1220 = vmatprep.subr.mxu1 %v1377_v2  ;;  %1150 = vmatpush1.msra.mxu0 %v1370_v1 }
 0x234   :  { %1221 = vmatpush1.msra.mxu1 %v1365_v0  ;;  %1183 = vmatprep.mubr.f32.mxu0 %v1329_v4 }
 0x235   :  { %1296 = vmatmul.mubr.msk.f32.vlgmr.msra.gmra.mxu0 %vm1115_vm1, %v20_v9  ;;  %1254 = vmatprep.mubr.f32.mxu1 %v1329_v4 }
 0x236   :  { %1297 = vmatmul.mubr.msk.f32.vlgmr.msra.gmra.mxu1 %vm1115_vm1, %v20_v9 }
 0x239   :  { %v1113_v57 = vpop.permute.xlu1 %1112 }
 0x2f1   :  { %v1035_v13 = vpop.f32.mrf.mxu0 }
 0x2f2   :  { %v1106_v34 = vpop.f32.mrf.mxu1  ;;  %v1036_v38 = vadd.f32 %v1035_v13, %v964_v3 }
 0x2f3   :  { %v1037_v35 = vpop.f32.mrf.mxu0  ;;  %v1107_v53 = vadd.f32 %v1106_v34, %v964_v3 }
 0x2f4   :  { %v1108_v36 = vpop.f32.mrf.mxu1  ;;  %v1038_v0 = vadd.f32 %v1037_v35, %v964_v3 }
 0x2f5   :  { %v1185_v37 = vpop.f32.mrf.mxu0  ;;  %v1109_v44 = vadd.f32 %v1108_v36, %v964_v3 }
 0x2f6   :  { %v1186_v39 = vadd.f32 %v1185_v37, %v1113_v57  ;;  %v1256_v2 = vpop.f32.mrf.mxu1 }
 0x2f7   :  { %v1257_v1 = vadd.f32 %v1256_v2, %v1113_v57  ;;  %v1187_v40 = vpop.f32.mrf.mxu0 }
 0x2f8   :  { %v1261_v41 = vadd.f32 %v1186_v39, %v1036_v38  ;;  %v1188_v42 = vadd.f32 %v1187_v40, %v1113_v57  ;;  %v1258_v43 = vpop.f32.mrf.mxu1 }
 0x2f9   :  { %v1263_v4 = vadd.f32 %v1257_v1, %v1107_v53  ;;  %v1259_v45 = vadd.f32 %v1258_v43, %v1113_v57 }
 0x2fa   :  { %v1265_v46 = vmax.f32 %v1261_v41, 0.0  ;;  %v1262_v47 = vadd.f32 %v1188_v42, %v1038_v0 }
 0x2fb   :  { %v1267_v48 = vmax.f32 %v1263_v4, 0.0  ;;  %v1264_v49 = vadd.f32 %v1259_v45, %v1109_v44 }
 0x2fc   :  { %1269 = vst [vmem:[%s1734_s3] sm:$0xff] %v1265_v46  ;;  %v1266_v50 = vmax.f32 %v1262_v47, 0.0 }
 0x2fd   :  { %1271 = vst [vmem:[%s1734_s3 + $0x10] sm:$0xff] %v1267_v48  ;;  %v1268_v52 = vmax.f32 %v1264_v49, 0.0 }
 0x2fe   :  { %1270 = vst [vmem:[%s1734_s3 + $0x8] sm:$0xff] %v1266_v50 }
 0x2ff   :  { %1272 = vst [vmem:[%s1734_s3 + $0x18] sm:$0xff] %v1268_v52 }

</bundles_post_ra>
